<compile_context>
chip_gen: v6e
topology: v6e:2x2x1
jax: 0.10.0
libtpu: 0.0.40
codegen_flags: <defaults>
</compile_context>

<pallas_src>
import math

import numpy as np
import jax
import jax.numpy as jnp
from jax.experimental import pallas as pl
from jax.experimental.pallas import tpu as pltpu

BN_EPS = 1e-5


def _compiler_params():
    return pltpu.CompilerParams(
        dimension_semantics=("parallel",),          # batch axis -> both TCs on v7x
        vmem_limit_bytes=32 * 1024 * 1024,
    )


def _col_ids(H, W):
    """(1, H*W) int32: column index (p mod W) of every flattened position."""
    col = (np.arange(H * W, dtype=np.int64) % W).astype(np.int32)
    return jnp.asarray(col[None, :])


# ---------------------------------------------------------------------------
# Shared InnerBlock math on a (C, H*W) fp32 tile (channels on sublanes,
# flattened spatial on lanes).
# ---------------------------------------------------------------------------
def _inner_block_body(x, col, H, W, rates,
                      wpre_ref, bpre_ref, wdw_ref, bdw_ref, wpost_ref, bpost_ref):
    HW = H * W
    Cp = wpre_ref.shape[1] // 9          # (padded) input channel count
    Cout = wpre_ref.shape[0]

    # Generic path for unpadded inputs (never taken in this configuration).
    if x.shape[0] != Cp:
        x = jnp.concatenate(
            [x, jnp.zeros((Cp - x.shape[0], HW), x.dtype)], axis=0)

    def shifted(v, dh, dw):
        """v[:, p] -> pixel value at (row+dh, col+dw), zero outside the image.

        Implemented as a flat lane shift with zero fill plus a static column
        mask; row out-of-range positions land in the zero fill or the column
        mask, so no row mask (and no padded scratch) is needed.
        """
        d = dh * W + dw
        if d == 0:
            s = v
        elif d > 0:
            s = jnp.concatenate(
                [v[:, d:], jnp.zeros((v.shape[0], d), v.dtype)], axis=1)
        else:
            s = jnp.concatenate(
                [jnp.zeros((v.shape[0], -d), v.dtype), v[:, :d]], axis=1)
        if dw > 0:
            s = jnp.where(col < (W - dw), s, 0.0)
        elif dw < 0:
            s = jnp.where(col >= (-dw), s, 0.0)
        return s

    # ---- pre_aspp: 3x3 conv as ONE K=9*Cin GEMM (+ folded BN + ReLU) ----
    patches = [shifted(x, kh - 1, kw - 1) for kh in range(3) for kw in range(3)]
    im2col = jnp.concatenate(patches, axis=0)                 # (9*Cp, HW)
    x1 = jnp.dot(wpre_ref[...], im2col, preferred_element_type=jnp.float32)
    x1 = jnp.maximum(x1 + bpre_ref[...], 0.0)                 # (Cout, HW)

    # ---- ASPP: dilated depthwise branches as VPU broadcast MACs ----
    # The reference's cumulative branch sum is folded into wpost host-side,
    # so only the per-rate ReLU'd branches are needed here.
    branches = []
    for r_idx, rate in enumerate(rates):
        acc = jnp.zeros_like(x1)
        for kh in range(3):
            for kw in range(3):
                c_idx = r_idx * 9 + kh * 3 + kw
                tap = shifted(x1, (kh - 1) * rate, (kw - 1) * rate)
                acc = acc + tap * wdw_ref[:, c_idx:c_idx + 1]
        branches.append(jnp.maximum(acc + bdw_ref[:, r_idx:r_idx + 1], 0.0))
    aspp = jnp.concatenate(branches, axis=0)                  # (R*Cout, HW)

    # ---- post_aspp: 1x1 conv over the virtual concat as ONE GEMM + residual ----
    y = jnp.dot(wpost_ref[...], aspp, preferred_element_type=jnp.float32)
    y = jnp.maximum(y + bpost_ref[...], 0.0)
    return x1 + y                                             # (Cout, HW)


# ---------------------------------------------------------------------------
# Fused InnerBlock kernel
# ---------------------------------------------------------------------------
def inner_block_apply(p, x):
    """Fused InnerBlock forward: x (N, Cin, H, W) NCHW -> (N, Cout, H, W)."""
    N, Cin, H, W = x.shape
    HW = H * W
    rates = p["rates"]
    R = len(rates)
    Cout = p["w_pre"].shape[0]
    Cp = p["w_pre"].shape[1] // 9        # input channels padded to sublane mult.

    col = _col_ids(H, W)
    x_flat = x.reshape(N, Cin, HW)       # free view: lane-dense (N, C, H*W)
    if Cp != Cin:
        x_flat = jnp.pad(x_flat, ((0, 0), (0, Cp - Cin), (0, 0)))

    def kernel(col_ref, x_ref, wpre_ref, bpre_ref, wdw_ref, bdw_ref,
               wpost_ref, bpost_ref, o_ref):
        out = _inner_block_body(x_ref[0].astype(jnp.float32), col_ref[...],
                                H, W, rates, wpre_ref, bpre_ref, wdw_ref,
                                bdw_ref, wpost_ref, bpost_ref)
        o_ref[0] = out.astype(o_ref.dtype)

    out = pl.pallas_call(
        kernel,
        out_shape=jax.ShapeDtypeStruct((N, Cout, HW), x.dtype),
        grid=(N,),
        in_specs=[
            pl.BlockSpec((1, HW), lambda n: (0, 0)),
            pl.BlockSpec((1, Cp, HW), lambda n: (n, 0, 0)),
            pl.BlockSpec((Cout, 9 * Cp), lambda n: (0, 0)),
            pl.BlockSpec((Cout, 1), lambda n: (0, 0)),
            pl.BlockSpec((Cout, R * 9), lambda n: (0, 0)),
            pl.BlockSpec((Cout, R), lambda n: (0, 0)),
            pl.BlockSpec((Cout, R * Cout), lambda n: (0, 0)),
            pl.BlockSpec((Cout, 1), lambda n: (0, 0)),
        ],
        out_specs=pl.BlockSpec((1, Cout, HW), lambda n: (n, 0, 0)),
        compiler_params=_compiler_params(),
    )(col, x_flat, p["w_pre"], p["b_pre"], p["w_dw"], p["b_dw"],
      p["w_post"], p["b_post"])
    return out.reshape(N, Cout, H, W)


# ---------------------------------------------------------------------------
# Fused bilinear top-down upsample + lateral add + layer InnerBlock
# ---------------------------------------------------------------------------
def _bilinear_matrix(out_size, in_size):
    """1-D matrix of F.interpolate(mode='bilinear', align_corners=False)."""
    A = np.zeros((out_size, in_size), np.float32)
    if in_size == 1:
        A[:, 0] = 1.0
        return A
    scale = in_size / out_size
    for d in range(out_size):
        s = max((d + 0.5) * scale - 0.5, 0.0)
        i0 = min(int(math.floor(s)), in_size - 1)
        i1 = min(i0 + 1, in_size - 1)
        f = s - i0
        A[d, i0] += 1.0 - f
        A[d, i1] += f
    return A


def merge_layer_apply(p, low, lat):
    """lat + bilinear_resize(low) followed by the layer InnerBlock, one kernel.

    low: (N, C, Hi, Wi) top-down path, lat: (N, C, Ho, Wo) lateral.
    Returns (result, merged), both (N, C, Ho, Wo) NCHW.
    """
    N, C, Hi, Wi = low.shape
    _, _, Ho, Wo = lat.shape
    HWi, HWo = Hi * Wi, Ho * Wo
    rates = p["rates"]
    R = len(rates)
    Cout = p["w_pre"].shape[0]
    Cp = p["w_pre"].shape[1] // 9

    # Bilinear resize over the flattened spatial dim is a fixed linear map.
    # TODO(synk): use the separable two-matmul form at production sizes.
    Mt = jnp.asarray(
        np.kron(_bilinear_matrix(Ho, Hi), _bilinear_matrix(Wo, Wi)).T)  # (HWi, HWo)
    col = _col_ids(Ho, Wo)
    low_flat = low.reshape(N, C, HWi)
    lat_flat = lat.reshape(N, C, HWo)

    def kernel(col_ref, mt_ref, low_ref, lat_ref, wpre_ref, bpre_ref, wdw_ref,
               bdw_ref, wpost_ref, bpost_ref, merged_ref, out_ref):
        merged = lat_ref[0].astype(jnp.float32) + jnp.dot(
            low_ref[0].astype(jnp.float32), mt_ref[...],
            preferred_element_type=jnp.float32)                # (C, HWo)
        merged_ref[0] = merged.astype(merged_ref.dtype)
        out = _inner_block_body(merged, col_ref[...], Ho, Wo, rates, wpre_ref,
                                bpre_ref, wdw_ref, bdw_ref, wpost_ref,
                                bpost_ref)
        out_ref[0] = out.astype(out_ref.dtype)

    merged, result = pl.pallas_call(
        kernel,
        out_shape=(jax.ShapeDtypeStruct((N, C, HWo), lat.dtype),
                   jax.ShapeDtypeStruct((N, Cout, HWo), lat.dtype)),
        grid=(N,),
        in_specs=[
            pl.BlockSpec((1, HWo), lambda n: (0, 0)),
            pl.BlockSpec((HWi, HWo), lambda n: (0, 0)),
            pl.BlockSpec((1, C, HWi), lambda n: (n, 0, 0)),
            pl.BlockSpec((1, C, HWo), lambda n: (n, 0, 0)),
            pl.BlockSpec((Cout, 9 * Cp), lambda n: (0, 0)),
            pl.BlockSpec((Cout, 1), lambda n: (0, 0)),
            pl.BlockSpec((Cout, R * 9), lambda n: (0, 0)),
            pl.BlockSpec((Cout, R), lambda n: (0, 0)),
            pl.BlockSpec((Cout, R * Cout), lambda n: (0, 0)),
            pl.BlockSpec((Cout, 1), lambda n: (0, 0)),
        ],
        out_specs=(pl.BlockSpec((1, C, HWo), lambda n: (n, 0, 0)),
                   pl.BlockSpec((1, Cout, HWo), lambda n: (n, 0, 0))),
        compiler_params=_compiler_params(),
    )(col, Mt, low_flat, lat_flat, p["w_pre"], p["b_pre"], p["w_dw"],
      p["b_dw"], p["w_post"], p["b_post"])
    return result.reshape(N, Cout, Ho, Wo), merged.reshape(N, C, Ho, Wo)


# ---------------------------------------------------------------------------
# Parameter construction (kaiming init, eval-mode BN folded into the weights,
# cumulative ASPP sum folded into the post 1x1 weights)
# ---------------------------------------------------------------------------
def _kaiming(key, shape, fan_in):
    return jax.random.normal(key, shape, jnp.float32) * math.sqrt(2.0 / fan_in)


def make_inner_block_params(key, in_c, out_c, rates):
    R = len(rates)
    keys = jax.random.split(key, 2 + R)
    bn_scale = 1.0 / math.sqrt(1.0 + BN_EPS)   # gamma=1, beta=0, mean=0, var=1

    # pre_aspp: Conv2d(in_c, out_c, 3, padding=1, bias=False); im2col layout
    # (out_c, (kh*3+kw)*cin_pad + cin).  Input channels are zero-padded to a
    # sublane multiple so the in-kernel im2col concat is 8-aligned.
    cin_p = -(-in_c // 8) * 8
    w_pre = _kaiming(keys[0], (out_c, in_c, 3, 3), in_c * 9) * bn_scale
    if cin_p != in_c:
        w_pre = jnp.pad(w_pre, ((0, 0), (0, cin_p - in_c), (0, 0), (0, 0)))
    w_pre = jnp.transpose(w_pre, (0, 2, 3, 1)).reshape(out_c, 9 * cin_p)

    # ASPP: depthwise Conv2d(out_c, out_c, 3, dilation=rate, groups=out_c).
    w_dw = jnp.stack([_kaiming(keys[2 + i], (out_c, 3, 3), 9) * bn_scale
                      for i in range(R)], axis=0)              # (R, out_c, 3, 3)
    w_dw = jnp.transpose(w_dw, (1, 0, 2, 3)).reshape(out_c, R * 9)

    # post_aspp: Conv2d(out_c*R, out_c, 1).  The reference feeds the 1x1 conv
    # the *cumulative* branch sums; since the conv is linear this is folded
    # host-side as W'_i = sum_{j>=i} W_j so the kernel only needs the plain
    # per-rate branches (no `temp` accumulator in the kernel).
    w_post = _kaiming(keys[1], (out_c, R, out_c), out_c * R) * bn_scale
    w_post = jnp.flip(jnp.cumsum(jnp.flip(w_post, axis=1), axis=1), axis=1)
    w_post = w_post.reshape(out_c, R * out_c)

    return {
        "rates": tuple(int(r) for r in rates),
        "w_pre": w_pre,                               # (out_c, 9*cin_pad)
        "b_pre": jnp.zeros((out_c, 1), jnp.float32),
        "w_dw": w_dw,                                 # (out_c, R*9)
        "b_dw": jnp.zeros((out_c, R), jnp.float32),
        "w_post": w_post,                             # (out_c, R*out_c), folded
        "b_post": jnp.zeros((out_c, 1), jnp.float32),
    }


def make_dfpn_params(key, in_channels_list, out_channels, dilations_list):
    params = {"inner": [], "layer": []}
    for in_c, rates in zip(in_channels_list, dilations_list):
        if in_c == 0:
            continue
        key, k1, k2 = jax.random.split(key, 3)
        params["inner"].append(make_inner_block_params(k1, in_c, out_channels, rates))
        params["layer"].append(make_inner_block_params(k2, out_channels, out_channels, rates))
    return params


def dfpn_forward(params, xs):
    """xs: list of NCHW feature maps, highest resolution first -> tuple (NCHW)."""
    last_inner = inner_block_apply(params["inner"][-1], xs[-1])
    results = [inner_block_apply(params["layer"][-1], last_inner)]
    for feat, p_in, p_lay in zip(xs[:-1][::-1],
                                 params["inner"][:-1][::-1],
                                 params["layer"][:-1][::-1]):
        lateral = inner_block_apply(p_in, feat)
        res, last_inner = merge_layer_apply(p_lay, last_inner, lateral)
        results.insert(0, res)
    # TODO(synk): top_blocks is None in this configuration (no extra levels).
    return tuple(results)


# ---------------------------------------------------------------------------
if __name__ == "__main__":
    key = jax.random.PRNGKey(0)

    in_channels_list = [4, 8]
    out_channels = 8
    dilations_list = [[1, 2], [1, 2]]

    kx0, kx1, kp = jax.random.split(key, 3)
    # NCHW inputs, same as the PyTorch reference: (2,4,16,16) and (2,8,8,8).
    x0 = jax.random.normal(kx0, (2, 4, 16, 16), jnp.float32)
    x1 = jax.random.normal(kx1, (2, 8, 8, 8), jnp.float32)

    params = make_dfpn_params(kp, in_channels_list, out_channels, dilations_list)

    results = dfpn_forward(params, [x0, x1])
    for r in results:
        jax.block_until_ready(r)

    assert results[0].shape == (2, out_channels, 16, 16)
    assert results[1].shape == (2, out_channels, 8, 8)
    assert all(bool(jnp.all(jnp.isfinite(r))) for r in results)
    print("KERNEL_OK")
</pallas_src>

<mosaic_0001>
module attributes {stable_mosaic.version = 11 : i64} {
  func.func @kernel(%arg0: i32, %arg1: memref<1x64xi32, #tpu.memory_space<vmem>>, %arg2: memref<1x8x64xf32, #tpu.memory_space<vmem>>, %arg3: memref<8x72xf32, #tpu.memory_space<vmem>>, %arg4: memref<8x1xf32, #tpu.memory_space<vmem>>, %arg5: memref<8x18xf32, #tpu.memory_space<vmem>>, %arg6: memref<8x2xf32, #tpu.memory_space<vmem>>, %arg7: memref<8x16xf32, #tpu.memory_space<vmem>>, %arg8: memref<8x1xf32, #tpu.memory_space<vmem>>, %arg9: memref<1x8x64xf32, #tpu.memory_space<vmem>>) attributes {dimension_semantics = [#tpu.dimension_semantics<parallel>], iteration_bounds = array<i64: 2>, scalar_prefetch = 0 : i64, scratch_operands = 0 : i64, tpu.core_type = #tpu.core_type<tc>, window_params = [{pipeline_mode = #tpu.pipeline_mode<synchronous>, transform_indices = @transform_0, window_bounds = array<i64: 1, 64>}, {transform_indices = @transform_1, window_bounds = array<i64: 1, 8, 64>}, {pipeline_mode = #tpu.pipeline_mode<synchronous>, transform_indices = @transform_2, window_bounds = array<i64: 8, 72>}, {pipeline_mode = #tpu.pipeline_mode<synchronous>, transform_indices = @transform_3, window_bounds = array<i64: 8, 1>}, {pipeline_mode = #tpu.pipeline_mode<synchronous>, transform_indices = @transform_4, window_bounds = array<i64: 8, 18>}, {pipeline_mode = #tpu.pipeline_mode<synchronous>, transform_indices = @transform_5, window_bounds = array<i64: 8, 2>}, {pipeline_mode = #tpu.pipeline_mode<synchronous>, transform_indices = @transform_6, window_bounds = array<i64: 8, 16>}, {pipeline_mode = #tpu.pipeline_mode<synchronous>, transform_indices = @transform_7, window_bounds = array<i64: 8, 1>}, {transform_indices = @transform_8, window_bounds = array<i64: 1, 8, 64>}]} {
    %c0 = arith.constant 0 : index
    %c0_0 = arith.constant 0 : index
    %c0_1 = arith.constant 0 : index
    %0 = vector.load %arg2[%c0, %c0_0, %c0_1] : memref<1x8x64xf32, #tpu.memory_space<vmem>>, vector<1x8x64xf32>
    %1 = vector.shape_cast %0 : vector<1x8x64xf32> to vector<8x64xf32>
    %c0_2 = arith.constant 0 : index
    %c0_3 = arith.constant 0 : index
    %2 = vector.load %arg1[%c0_2, %c0_3] : memref<1x64xi32, #tpu.memory_space<vmem>>, vector<1x64xi32>
    %cst = arith.constant 0.000000e+00 : f32
    %3 = vector.broadcast %cst : f32 to vector<8x9xf32>
    %4 = vector.extract_strided_slice %1 {offsets = [0, 0], sizes = [8, 55], strides = [1, 1]} : vector<8x64xf32> to vector<8x55xf32>
    %5 = tpu.concatenate %3, %4 in 1 : vector<8x9xf32>, vector<8x55xf32> -> vector<8x64xf32>
    %c1_i32 = arith.constant 1 : i32
    %6 = vector.broadcast %c1_i32 : i32 to vector<1x64xi32>
    %7 = arith.cmpi sge, %2, %6 : vector<1x64xi32>
    %cst_4 = arith.constant 0.000000e+00 : f32
    %8 = vector.shape_cast %7 : vector<1x64xi1> to vector<1x64xi1>
    %9 = vector.broadcast %8 : vector<1x64xi1> to vector<8x64xi1>
    %10 = vector.broadcast %cst_4 : f32 to vector<8x64xf32>
    %11 = arith.select %9, %5, %10 : vector<8x64xi1>, vector<8x64xf32>
    %cst_5 = arith.constant 0.000000e+00 : f32
    %12 = vector.broadcast %cst_5 : f32 to vector<8x8xf32>
    %13 = vector.extract_strided_slice %1 {offsets = [0, 0], sizes = [8, 56], strides = [1, 1]} : vector<8x64xf32> to vector<8x56xf32>
    %14 = tpu.concatenate %12, %13 in 1 : vector<8x8xf32>, vector<8x56xf32> -> vector<8x64xf32>
    %cst_6 = arith.constant 0.000000e+00 : f32
    %15 = vector.broadcast %cst_6 : f32 to vector<8x7xf32>
    %16 = vector.extract_strided_slice %1 {offsets = [0, 0], sizes = [8, 57], strides = [1, 1]} : vector<8x64xf32> to vector<8x57xf32>
    %17 = tpu.concatenate %15, %16 in 1 : vector<8x7xf32>, vector<8x57xf32> -> vector<8x64xf32>
    %c7_i32 = arith.constant 7 : i32
    %18 = vector.broadcast %c7_i32 : i32 to vector<1x64xi32>
    %19 = arith.cmpi slt, %2, %18 : vector<1x64xi32>
    %cst_7 = arith.constant 0.000000e+00 : f32
    %20 = vector.shape_cast %19 : vector<1x64xi1> to vector<1x64xi1>
    %21 = vector.broadcast %20 : vector<1x64xi1> to vector<8x64xi1>
    %22 = vector.broadcast %cst_7 : f32 to vector<8x64xf32>
    %23 = arith.select %21, %17, %22 : vector<8x64xi1>, vector<8x64xf32>
    %cst_8 = arith.constant 0.000000e+00 : f32
    %24 = vector.broadcast %cst_8 : f32 to vector<8x1xf32>
    %25 = vector.extract_strided_slice %1 {offsets = [0, 0], sizes = [8, 63], strides = [1, 1]} : vector<8x64xf32> to vector<8x63xf32>
    %26 = tpu.concatenate %24, %25 in 1 : vector<8x1xf32>, vector<8x63xf32> -> vector<8x64xf32>
    %c1_i32_9 = arith.constant 1 : i32
    %27 = vector.broadcast %c1_i32_9 : i32 to vector<1x64xi32>
    %28 = arith.cmpi sge, %2, %27 : vector<1x64xi32>
    %cst_10 = arith.constant 0.000000e+00 : f32
    %29 = vector.shape_cast %28 : vector<1x64xi1> to vector<1x64xi1>
    %30 = vector.broadcast %29 : vector<1x64xi1> to vector<8x64xi1>
    %31 = vector.broadcast %cst_10 : f32 to vector<8x64xf32>
    %32 = arith.select %30, %26, %31 : vector<8x64xi1>, vector<8x64xf32>
    %33 = vector.extract_strided_slice %1 {offsets = [0, 1], sizes = [8, 63], strides = [1, 1]} : vector<8x64xf32> to vector<8x63xf32>
    %cst_11 = arith.constant 0.000000e+00 : f32
    %34 = vector.broadcast %cst_11 : f32 to vector<8x1xf32>
    %35 = tpu.concatenate %33, %34 in 1 : vector<8x63xf32>, vector<8x1xf32> -> vector<8x64xf32>
    %c7_i32_12 = arith.constant 7 : i32
    %36 = vector.broadcast %c7_i32_12 : i32 to vector<1x64xi32>
    %37 = arith.cmpi slt, %2, %36 : vector<1x64xi32>
    %cst_13 = arith.constant 0.000000e+00 : f32
    %38 = vector.shape_cast %37 : vector<1x64xi1> to vector<1x64xi1>
    %39 = vector.broadcast %38 : vector<1x64xi1> to vector<8x64xi1>
    %40 = vector.broadcast %cst_13 : f32 to vector<8x64xf32>
    %41 = arith.select %39, %35, %40 : vector<8x64xi1>, vector<8x64xf32>
    %42 = vector.extract_strided_slice %1 {offsets = [0, 7], sizes = [8, 57], strides = [1, 1]} : vector<8x64xf32> to vector<8x57xf32>
    %cst_14 = arith.constant 0.000000e+00 : f32
    %43 = vector.broadcast %cst_14 : f32 to vector<8x7xf32>
    %44 = tpu.concatenate %42, %43 in 1 : vector<8x57xf32>, vector<8x7xf32> -> vector<8x64xf32>
    %c1_i32_15 = arith.constant 1 : i32
    %45 = vector.broadcast %c1_i32_15 : i32 to vector<1x64xi32>
    %46 = arith.cmpi sge, %2, %45 : vector<1x64xi32>
    %cst_16 = arith.constant 0.000000e+00 : f32
    %47 = vector.shape_cast %46 : vector<1x64xi1> to vector<1x64xi1>
    %48 = vector.broadcast %47 : vector<1x64xi1> to vector<8x64xi1>
    %49 = vector.broadcast %cst_16 : f32 to vector<8x64xf32>
    %50 = arith.select %48, %44, %49 : vector<8x64xi1>, vector<8x64xf32>
    %51 = vector.extract_strided_slice %1 {offsets = [0, 8], sizes = [8, 56], strides = [1, 1]} : vector<8x64xf32> to vector<8x56xf32>
    %cst_17 = arith.constant 0.000000e+00 : f32
    %52 = vector.broadcast %cst_17 : f32 to vector<8x8xf32>
    %53 = tpu.concatenate %51, %52 in 1 : vector<8x56xf32>, vector<8x8xf32> -> vector<8x64xf32>
    %54 = vector.extract_strided_slice %1 {offsets = [0, 9], sizes = [8, 55], strides = [1, 1]} : vector<8x64xf32> to vector<8x55xf32>
    %cst_18 = arith.constant 0.000000e+00 : f32
    %55 = vector.broadcast %cst_18 : f32 to vector<8x9xf32>
    %56 = tpu.concatenate %54, %55 in 1 : vector<8x55xf32>, vector<8x9xf32> -> vector<8x64xf32>
    %c7_i32_19 = arith.constant 7 : i32
    %57 = vector.broadcast %c7_i32_19 : i32 to vector<1x64xi32>
    %58 = arith.cmpi slt, %2, %57 : vector<1x64xi32>
    %cst_20 = arith.constant 0.000000e+00 : f32
    %59 = vector.shape_cast %58 : vector<1x64xi1> to vector<1x64xi1>
    %60 = vector.broadcast %59 : vector<1x64xi1> to vector<8x64xi1>
    %61 = vector.broadcast %cst_20 : f32 to vector<8x64xf32>
    %62 = arith.select %60, %56, %61 : vector<8x64xi1>, vector<8x64xf32>
    %63 = tpu.concatenate %11, %14, %23, %32, %1, %41, %50, %53, %62 in 0 : vector<8x64xf32>, vector<8x64xf32>, vector<8x64xf32>, vector<8x64xf32>, vector<8x64xf32>, vector<8x64xf32>, vector<8x64xf32>, vector<8x64xf32>, vector<8x64xf32> -> vector<72x64xf32>
    %c0_21 = arith.constant 0 : index
    %c0_22 = arith.constant 0 : index
    %64 = vector.load %arg3[%c0_21, %c0_22] : memref<8x72xf32, #tpu.memory_space<vmem>>, vector<8x72xf32>
    %cst_23 = arith.constant dense<0.000000e+00> : vector<8x64xf32>
    %65 = tpu.matmul %64, %63, %cst_23 {dimension_numbers = #tpu.dot_dimension_numbers<[1], [0], [0], [1], [0, 0, 1, 1], [], []>} : vector<8x72xf32>, vector<72x64xf32>, vector<8x64xf32> -> vector<8x64xf32>
    %c0_24 = arith.constant 0 : index
    %c0_25 = arith.constant 0 : index
    %66 = vector.load %arg4[%c0_24, %c0_25] : memref<8x1xf32, #tpu.memory_space<vmem>>, vector<8x1xf32>
    %67 = vector.broadcast %66 : vector<8x1xf32> to vector<8x64xf32>
    %68 = arith.addf %65, %67 : vector<8x64xf32>
    %cst_26 = arith.constant 0.000000e+00 : f32
    %69 = vector.broadcast %cst_26 : f32 to vector<8x64xf32>
    %70 = arith.maximumf %68, %69 : vector<8x64xf32>
    %cst_27 = arith.constant 0.000000e+00 : f32
    %71 = vector.broadcast %cst_27 : f32 to vector<8x64xf32>
    %cst_28 = arith.constant 0.000000e+00 : f32
    %72 = vector.broadcast %cst_28 : f32 to vector<8x9xf32>
    %73 = vector.extract_strided_slice %70 {offsets = [0, 0], sizes = [8, 55], strides = [1, 1]} : vector<8x64xf32> to vector<8x55xf32>
    %74 = tpu.concatenate %72, %73 in 1 : vector<8x9xf32>, vector<8x55xf32> -> vector<8x64xf32>
    %c1_i32_29 = arith.constant 1 : i32
    %75 = vector.broadcast %c1_i32_29 : i32 to vector<1x64xi32>
    %76 = arith.cmpi sge, %2, %75 : vector<1x64xi32>
    %cst_30 = arith.constant 0.000000e+00 : f32
    %77 = vector.shape_cast %76 : vector<1x64xi1> to vector<1x64xi1>
    %78 = vector.broadcast %77 : vector<1x64xi1> to vector<8x64xi1>
    %79 = vector.broadcast %cst_30 : f32 to vector<8x64xf32>
    %80 = arith.select %78, %74, %79 : vector<8x64xi1>, vector<8x64xf32>
    %c0_31 = arith.constant 0 : index
    %c0_32 = arith.constant 0 : index
    %81 = vector.load %arg5[%c0_31, %c0_32] : memref<8x18xf32, #tpu.memory_space<vmem>>, vector<8x1xf32>
    %82 = vector.broadcast %81 : vector<8x1xf32> to vector<8x64xf32>
    %83 = arith.mulf %80, %82 : vector<8x64xf32>
    %84 = arith.addf %71, %83 : vector<8x64xf32>
    %cst_33 = arith.constant 0.000000e+00 : f32
    %85 = vector.broadcast %cst_33 : f32 to vector<8x8xf32>
    %86 = vector.extract_strided_slice %70 {offsets = [0, 0], sizes = [8, 56], strides = [1, 1]} : vector<8x64xf32> to vector<8x56xf32>
    %87 = tpu.concatenate %85, %86 in 1 : vector<8x8xf32>, vector<8x56xf32> -> vector<8x64xf32>
    %c0_34 = arith.constant 0 : index
    %c1 = arith.constant 1 : index
    %88 = vector.load %arg5[%c0_34, %c1] : memref<8x18xf32, #tpu.memory_space<vmem>>, vector<8x1xf32>
    %89 = vector.broadcast %88 : vector<8x1xf32> to vector<8x64xf32>
    %90 = arith.mulf %87, %89 : vector<8x64xf32>
    %91 = arith.addf %84, %90 : vector<8x64xf32>
    %cst_35 = arith.constant 0.000000e+00 : f32
    %92 = vector.broadcast %cst_35 : f32 to vector<8x7xf32>
    %93 = vector.extract_strided_slice %70 {offsets = [0, 0], sizes = [8, 57], strides = [1, 1]} : vector<8x64xf32> to vector<8x57xf32>
    %94 = tpu.concatenate %92, %93 in 1 : vector<8x7xf32>, vector<8x57xf32> -> vector<8x64xf32>
    %c7_i32_36 = arith.constant 7 : i32
    %95 = vector.broadcast %c7_i32_36 : i32 to vector<1x64xi32>
    %96 = arith.cmpi slt, %2, %95 : vector<1x64xi32>
    %cst_37 = arith.constant 0.000000e+00 : f32
    %97 = vector.shape_cast %96 : vector<1x64xi1> to vector<1x64xi1>
    %98 = vector.broadcast %97 : vector<1x64xi1> to vector<8x64xi1>
    %99 = vector.broadcast %cst_37 : f32 to vector<8x64xf32>
    %100 = arith.select %98, %94, %99 : vector<8x64xi1>, vector<8x64xf32>
    %c0_38 = arith.constant 0 : index
    %c2 = arith.constant 2 : index
    %101 = vector.load %arg5[%c0_38, %c2] : memref<8x18xf32, #tpu.memory_space<vmem>>, vector<8x1xf32>
    %102 = vector.broadcast %101 : vector<8x1xf32> to vector<8x64xf32>
    %103 = arith.mulf %100, %102 : vector<8x64xf32>
    %104 = arith.addf %91, %103 : vector<8x64xf32>
    %cst_39 = arith.constant 0.000000e+00 : f32
    %105 = vector.broadcast %cst_39 : f32 to vector<8x1xf32>
    %106 = vector.extract_strided_slice %70 {offsets = [0, 0], sizes = [8, 63], strides = [1, 1]} : vector<8x64xf32> to vector<8x63xf32>
    %107 = tpu.concatenate %105, %106 in 1 : vector<8x1xf32>, vector<8x63xf32> -> vector<8x64xf32>
    %c1_i32_40 = arith.constant 1 : i32
    %108 = vector.broadcast %c1_i32_40 : i32 to vector<1x64xi32>
    %109 = arith.cmpi sge, %2, %108 : vector<1x64xi32>
    %cst_41 = arith.constant 0.000000e+00 : f32
    %110 = vector.shape_cast %109 : vector<1x64xi1> to vector<1x64xi1>
    %111 = vector.broadcast %110 : vector<1x64xi1> to vector<8x64xi1>
    %112 = vector.broadcast %cst_41 : f32 to vector<8x64xf32>
    %113 = arith.select %111, %107, %112 : vector<8x64xi1>, vector<8x64xf32>
    %c0_42 = arith.constant 0 : index
    %c3 = arith.constant 3 : index
    %114 = vector.load %arg5[%c0_42, %c3] : memref<8x18xf32, #tpu.memory_space<vmem>>, vector<8x1xf32>
    %115 = vector.broadcast %114 : vector<8x1xf32> to vector<8x64xf32>
    %116 = arith.mulf %113, %115 : vector<8x64xf32>
    %117 = arith.addf %104, %116 : vector<8x64xf32>
    %c0_43 = arith.constant 0 : index
    %c4 = arith.constant 4 : index
    %118 = vector.load %arg5[%c0_43, %c4] : memref<8x18xf32, #tpu.memory_space<vmem>>, vector<8x1xf32>
    %119 = vector.broadcast %118 : vector<8x1xf32> to vector<8x64xf32>
    %120 = arith.mulf %70, %119 : vector<8x64xf32>
    %121 = arith.addf %117, %120 : vector<8x64xf32>
    %122 = vector.extract_strided_slice %70 {offsets = [0, 1], sizes = [8, 63], strides = [1, 1]} : vector<8x64xf32> to vector<8x63xf32>
    %cst_44 = arith.constant 0.000000e+00 : f32
    %123 = vector.broadcast %cst_44 : f32 to vector<8x1xf32>
    %124 = tpu.concatenate %122, %123 in 1 : vector<8x63xf32>, vector<8x1xf32> -> vector<8x64xf32>
    %c7_i32_45 = arith.constant 7 : i32
    %125 = vector.broadcast %c7_i32_45 : i32 to vector<1x64xi32>
    %126 = arith.cmpi slt, %2, %125 : vector<1x64xi32>
    %cst_46 = arith.constant 0.000000e+00 : f32
    %127 = vector.shape_cast %126 : vector<1x64xi1> to vector<1x64xi1>
    %128 = vector.broadcast %127 : vector<1x64xi1> to vector<8x64xi1>
    %129 = vector.broadcast %cst_46 : f32 to vector<8x64xf32>
    %130 = arith.select %128, %124, %129 : vector<8x64xi1>, vector<8x64xf32>
    %c0_47 = arith.constant 0 : index
    %c5 = arith.constant 5 : index
    %131 = vector.load %arg5[%c0_47, %c5] : memref<8x18xf32, #tpu.memory_space<vmem>>, vector<8x1xf32>
    %132 = vector.broadcast %131 : vector<8x1xf32> to vector<8x64xf32>
    %133 = arith.mulf %130, %132 : vector<8x64xf32>
    %134 = arith.addf %121, %133 : vector<8x64xf32>
    %135 = vector.extract_strided_slice %70 {offsets = [0, 7], sizes = [8, 57], strides = [1, 1]} : vector<8x64xf32> to vector<8x57xf32>
    %cst_48 = arith.constant 0.000000e+00 : f32
    %136 = vector.broadcast %cst_48 : f32 to vector<8x7xf32>
    %137 = tpu.concatenate %135, %136 in 1 : vector<8x57xf32>, vector<8x7xf32> -> vector<8x64xf32>
    %c1_i32_49 = arith.constant 1 : i32
    %138 = vector.broadcast %c1_i32_49 : i32 to vector<1x64xi32>
    %139 = arith.cmpi sge, %2, %138 : vector<1x64xi32>
    %cst_50 = arith.constant 0.000000e+00 : f32
    %140 = vector.shape_cast %139 : vector<1x64xi1> to vector<1x64xi1>
    %141 = vector.broadcast %140 : vector<1x64xi1> to vector<8x64xi1>
    %142 = vector.broadcast %cst_50 : f32 to vector<8x64xf32>
    %143 = arith.select %141, %137, %142 : vector<8x64xi1>, vector<8x64xf32>
    %c0_51 = arith.constant 0 : index
    %c6 = arith.constant 6 : index
    %144 = vector.load %arg5[%c0_51, %c6] : memref<8x18xf32, #tpu.memory_space<vmem>>, vector<8x1xf32>
    %145 = vector.broadcast %144 : vector<8x1xf32> to vector<8x64xf32>
    %146 = arith.mulf %143, %145 : vector<8x64xf32>
    %147 = arith.addf %134, %146 : vector<8x64xf32>
    %148 = vector.extract_strided_slice %70 {offsets = [0, 8], sizes = [8, 56], strides = [1, 1]} : vector<8x64xf32> to vector<8x56xf32>
    %cst_52 = arith.constant 0.000000e+00 : f32
    %149 = vector.broadcast %cst_52 : f32 to vector<8x8xf32>
    %150 = tpu.concatenate %148, %149 in 1 : vector<8x56xf32>, vector<8x8xf32> -> vector<8x64xf32>
    %c0_53 = arith.constant 0 : index
    %c7 = arith.constant 7 : index
    %151 = vector.load %arg5[%c0_53, %c7] : memref<8x18xf32, #tpu.memory_space<vmem>>, vector<8x1xf32>
    %152 = vector.broadcast %151 : vector<8x1xf32> to vector<8x64xf32>
    %153 = arith.mulf %150, %152 : vector<8x64xf32>
    %154 = arith.addf %147, %153 : vector<8x64xf32>
    %155 = vector.extract_strided_slice %70 {offsets = [0, 9], sizes = [8, 55], strides = [1, 1]} : vector<8x64xf32> to vector<8x55xf32>
    %cst_54 = arith.constant 0.000000e+00 : f32
    %156 = vector.broadcast %cst_54 : f32 to vector<8x9xf32>
    %157 = tpu.concatenate %155, %156 in 1 : vector<8x55xf32>, vector<8x9xf32> -> vector<8x64xf32>
    %c7_i32_55 = arith.constant 7 : i32
    %158 = vector.broadcast %c7_i32_55 : i32 to vector<1x64xi32>
    %159 = arith.cmpi slt, %2, %158 : vector<1x64xi32>
    %cst_56 = arith.constant 0.000000e+00 : f32
    %160 = vector.shape_cast %159 : vector<1x64xi1> to vector<1x64xi1>
    %161 = vector.broadcast %160 : vector<1x64xi1> to vector<8x64xi1>
    %162 = vector.broadcast %cst_56 : f32 to vector<8x64xf32>
    %163 = arith.select %161, %157, %162 : vector<8x64xi1>, vector<8x64xf32>
    %c0_57 = arith.constant 0 : index
    %c8 = arith.constant 8 : index
    %164 = vector.load %arg5[%c0_57, %c8] : memref<8x18xf32, #tpu.memory_space<vmem>>, vector<8x1xf32>
    %165 = vector.broadcast %164 : vector<8x1xf32> to vector<8x64xf32>
    %166 = arith.mulf %163, %165 : vector<8x64xf32>
    %167 = arith.addf %154, %166 : vector<8x64xf32>
    %c0_58 = arith.constant 0 : index
    %c0_59 = arith.constant 0 : index
    %168 = vector.load %arg6[%c0_58, %c0_59] : memref<8x2xf32, #tpu.memory_space<vmem>>, vector<8x1xf32>
    %169 = vector.broadcast %168 : vector<8x1xf32> to vector<8x64xf32>
    %170 = arith.addf %167, %169 : vector<8x64xf32>
    %cst_60 = arith.constant 0.000000e+00 : f32
    %171 = vector.broadcast %cst_60 : f32 to vector<8x64xf32>
    %172 = arith.maximumf %170, %171 : vector<8x64xf32>
    %cst_61 = arith.constant 0.000000e+00 : f32
    %173 = vector.broadcast %cst_61 : f32 to vector<8x64xf32>
    %cst_62 = arith.constant 0.000000e+00 : f32
    %174 = vector.broadcast %cst_62 : f32 to vector<8x18xf32>
    %175 = vector.extract_strided_slice %70 {offsets = [0, 0], sizes = [8, 46], strides = [1, 1]} : vector<8x64xf32> to vector<8x46xf32>
    %176 = tpu.concatenate %174, %175 in 1 : vector<8x18xf32>, vector<8x46xf32> -> vector<8x64xf32>
    %c2_i32 = arith.constant 2 : i32
    %177 = vector.broadcast %c2_i32 : i32 to vector<1x64xi32>
    %178 = arith.cmpi sge, %2, %177 : vector<1x64xi32>
    %cst_63 = arith.constant 0.000000e+00 : f32
    %179 = vector.shape_cast %178 : vector<1x64xi1> to vector<1x64xi1>
    %180 = vector.broadcast %179 : vector<1x64xi1> to vector<8x64xi1>
    %181 = vector.broadcast %cst_63 : f32 to vector<8x64xf32>
    %182 = arith.select %180, %176, %181 : vector<8x64xi1>, vector<8x64xf32>
    %c0_64 = arith.constant 0 : index
    %c9 = arith.constant 9 : index
    %183 = vector.load %arg5[%c0_64, %c9] : memref<8x18xf32, #tpu.memory_space<vmem>>, vector<8x1xf32>
    %184 = vector.broadcast %183 : vector<8x1xf32> to vector<8x64xf32>
    %185 = arith.mulf %182, %184 : vector<8x64xf32>
    %186 = arith.addf %173, %185 : vector<8x64xf32>
    %cst_65 = arith.constant 0.000000e+00 : f32
    %187 = vector.broadcast %cst_65 : f32 to vector<8x16xf32>
    %188 = vector.extract_strided_slice %70 {offsets = [0, 0], sizes = [8, 48], strides = [1, 1]} : vector<8x64xf32> to vector<8x48xf32>
    %189 = tpu.concatenate %187, %188 in 1 : vector<8x16xf32>, vector<8x48xf32> -> vector<8x64xf32>
    %c0_66 = arith.constant 0 : index
    %c10 = arith.constant 10 : index
    %190 = vector.load %arg5[%c0_66, %c10] : memref<8x18xf32, #tpu.memory_space<vmem>>, vector<8x1xf32>
    %191 = vector.broadcast %190 : vector<8x1xf32> to vector<8x64xf32>
    %192 = arith.mulf %189, %191 : vector<8x64xf32>
    %193 = arith.addf %186, %192 : vector<8x64xf32>
    %cst_67 = arith.constant 0.000000e+00 : f32
    %194 = vector.broadcast %cst_67 : f32 to vector<8x14xf32>
    %195 = vector.extract_strided_slice %70 {offsets = [0, 0], sizes = [8, 50], strides = [1, 1]} : vector<8x64xf32> to vector<8x50xf32>
    %196 = tpu.concatenate %194, %195 in 1 : vector<8x14xf32>, vector<8x50xf32> -> vector<8x64xf32>
    %c6_i32 = arith.constant 6 : i32
    %197 = vector.broadcast %c6_i32 : i32 to vector<1x64xi32>
    %198 = arith.cmpi slt, %2, %197 : vector<1x64xi32>
    %cst_68 = arith.constant 0.000000e+00 : f32
    %199 = vector.shape_cast %198 : vector<1x64xi1> to vector<1x64xi1>
    %200 = vector.broadcast %199 : vector<1x64xi1> to vector<8x64xi1>
    %201 = vector.broadcast %cst_68 : f32 to vector<8x64xf32>
    %202 = arith.select %200, %196, %201 : vector<8x64xi1>, vector<8x64xf32>
    %c0_69 = arith.constant 0 : index
    %c11 = arith.constant 11 : index
    %203 = vector.load %arg5[%c0_69, %c11] : memref<8x18xf32, #tpu.memory_space<vmem>>, vector<8x1xf32>
    %204 = vector.broadcast %203 : vector<8x1xf32> to vector<8x64xf32>
    %205 = arith.mulf %202, %204 : vector<8x64xf32>
    %206 = arith.addf %193, %205 : vector<8x64xf32>
    %cst_70 = arith.constant 0.000000e+00 : f32
    %207 = vector.broadcast %cst_70 : f32 to vector<8x2xf32>
    %208 = vector.extract_strided_slice %70 {offsets = [0, 0], sizes = [8, 62], strides = [1, 1]} : vector<8x64xf32> to vector<8x62xf32>
    %209 = tpu.concatenate %207, %208 in 1 : vector<8x2xf32>, vector<8x62xf32> -> vector<8x64xf32>
    %c2_i32_71 = arith.constant 2 : i32
    %210 = vector.broadcast %c2_i32_71 : i32 to vector<1x64xi32>
    %211 = arith.cmpi sge, %2, %210 : vector<1x64xi32>
    %cst_72 = arith.constant 0.000000e+00 : f32
    %212 = vector.shape_cast %211 : vector<1x64xi1> to vector<1x64xi1>
    %213 = vector.broadcast %212 : vector<1x64xi1> to vector<8x64xi1>
    %214 = vector.broadcast %cst_72 : f32 to vector<8x64xf32>
    %215 = arith.select %213, %209, %214 : vector<8x64xi1>, vector<8x64xf32>
    %c0_73 = arith.constant 0 : index
    %c12 = arith.constant 12 : index
    %216 = vector.load %arg5[%c0_73, %c12] : memref<8x18xf32, #tpu.memory_space<vmem>>, vector<8x1xf32>
    %217 = vector.broadcast %216 : vector<8x1xf32> to vector<8x64xf32>
    %218 = arith.mulf %215, %217 : vector<8x64xf32>
    %219 = arith.addf %206, %218 : vector<8x64xf32>
    %c0_74 = arith.constant 0 : index
    %c13 = arith.constant 13 : index
    %220 = vector.load %arg5[%c0_74, %c13] : memref<8x18xf32, #tpu.memory_space<vmem>>, vector<8x1xf32>
    %221 = vector.broadcast %220 : vector<8x1xf32> to vector<8x64xf32>
    %222 = arith.mulf %70, %221 : vector<8x64xf32>
    %223 = arith.addf %219, %222 : vector<8x64xf32>
    %224 = vector.extract_strided_slice %70 {offsets = [0, 2], sizes = [8, 62], strides = [1, 1]} : vector<8x64xf32> to vector<8x62xf32>
    %cst_75 = arith.constant 0.000000e+00 : f32
    %225 = vector.broadcast %cst_75 : f32 to vector<8x2xf32>
    %226 = tpu.concatenate %224, %225 in 1 : vector<8x62xf32>, vector<8x2xf32> -> vector<8x64xf32>
    %c6_i32_76 = arith.constant 6 : i32
    %227 = vector.broadcast %c6_i32_76 : i32 to vector<1x64xi32>
    %228 = arith.cmpi slt, %2, %227 : vector<1x64xi32>
    %cst_77 = arith.constant 0.000000e+00 : f32
    %229 = vector.shape_cast %228 : vector<1x64xi1> to vector<1x64xi1>
    %230 = vector.broadcast %229 : vector<1x64xi1> to vector<8x64xi1>
    %231 = vector.broadcast %cst_77 : f32 to vector<8x64xf32>
    %232 = arith.select %230, %226, %231 : vector<8x64xi1>, vector<8x64xf32>
    %c0_78 = arith.constant 0 : index
    %c14 = arith.constant 14 : index
    %233 = vector.load %arg5[%c0_78, %c14] : memref<8x18xf32, #tpu.memory_space<vmem>>, vector<8x1xf32>
    %234 = vector.broadcast %233 : vector<8x1xf32> to vector<8x64xf32>
    %235 = arith.mulf %232, %234 : vector<8x64xf32>
    %236 = arith.addf %223, %235 : vector<8x64xf32>
    %237 = vector.extract_strided_slice %70 {offsets = [0, 14], sizes = [8, 50], strides = [1, 1]} : vector<8x64xf32> to vector<8x50xf32>
    %cst_79 = arith.constant 0.000000e+00 : f32
    %238 = vector.broadcast %cst_79 : f32 to vector<8x14xf32>
    %239 = tpu.concatenate %237, %238 in 1 : vector<8x50xf32>, vector<8x14xf32> -> vector<8x64xf32>
    %c2_i32_80 = arith.constant 2 : i32
    %240 = vector.broadcast %c2_i32_80 : i32 to vector<1x64xi32>
    %241 = arith.cmpi sge, %2, %240 : vector<1x64xi32>
    %cst_81 = arith.constant 0.000000e+00 : f32
    %242 = vector.shape_cast %241 : vector<1x64xi1> to vector<1x64xi1>
    %243 = vector.broadcast %242 : vector<1x64xi1> to vector<8x64xi1>
    %244 = vector.broadcast %cst_81 : f32 to vector<8x64xf32>
    %245 = arith.select %243, %239, %244 : vector<8x64xi1>, vector<8x64xf32>
    %c0_82 = arith.constant 0 : index
    %c15 = arith.constant 15 : index
    %246 = vector.load %arg5[%c0_82, %c15] : memref<8x18xf32, #tpu.memory_space<vmem>>, vector<8x1xf32>
    %247 = vector.broadcast %246 : vector<8x1xf32> to vector<8x64xf32>
    %248 = arith.mulf %245, %247 : vector<8x64xf32>
    %249 = arith.addf %236, %248 : vector<8x64xf32>
    %250 = vector.extract_strided_slice %70 {offsets = [0, 16], sizes = [8, 48], strides = [1, 1]} : vector<8x64xf32> to vector<8x48xf32>
    %cst_83 = arith.constant 0.000000e+00 : f32
    %251 = vector.broadcast %cst_83 : f32 to vector<8x16xf32>
    %252 = tpu.concatenate %250, %251 in 1 : vector<8x48xf32>, vector<8x16xf32> -> vector<8x64xf32>
    %c0_84 = arith.constant 0 : index
    %c16 = arith.constant 16 : index
    %253 = vector.load %arg5[%c0_84, %c16] : memref<8x18xf32, #tpu.memory_space<vmem>>, vector<8x1xf32>
    %254 = vector.broadcast %253 : vector<8x1xf32> to vector<8x64xf32>
    %255 = arith.mulf %252, %254 : vector<8x64xf32>
    %256 = arith.addf %249, %255 : vector<8x64xf32>
    %257 = vector.extract_strided_slice %70 {offsets = [0, 18], sizes = [8, 46], strides = [1, 1]} : vector<8x64xf32> to vector<8x46xf32>
    %cst_85 = arith.constant 0.000000e+00 : f32
    %258 = vector.broadcast %cst_85 : f32 to vector<8x18xf32>
    %259 = tpu.concatenate %257, %258 in 1 : vector<8x46xf32>, vector<8x18xf32> -> vector<8x64xf32>
    %c6_i32_86 = arith.constant 6 : i32
    %260 = vector.broadcast %c6_i32_86 : i32 to vector<1x64xi32>
    %261 = arith.cmpi slt, %2, %260 : vector<1x64xi32>
    %cst_87 = arith.constant 0.000000e+00 : f32
    %262 = vector.shape_cast %261 : vector<1x64xi1> to vector<1x64xi1>
    %263 = vector.broadcast %262 : vector<1x64xi1> to vector<8x64xi1>
    %264 = vector.broadcast %cst_87 : f32 to vector<8x64xf32>
    %265 = arith.select %263, %259, %264 : vector<8x64xi1>, vector<8x64xf32>
    %c0_88 = arith.constant 0 : index
    %c17 = arith.constant 17 : index
    %266 = vector.load %arg5[%c0_88, %c17] : memref<8x18xf32, #tpu.memory_space<vmem>>, vector<8x1xf32>
    %267 = vector.broadcast %266 : vector<8x1xf32> to vector<8x64xf32>
    %268 = arith.mulf %265, %267 : vector<8x64xf32>
    %269 = arith.addf %256, %268 : vector<8x64xf32>
    %c0_89 = arith.constant 0 : index
    %c1_90 = arith.constant 1 : index
    %270 = vector.load %arg6[%c0_89, %c1_90] : memref<8x2xf32, #tpu.memory_space<vmem>>, vector<8x1xf32>
    %271 = vector.broadcast %270 : vector<8x1xf32> to vector<8x64xf32>
    %272 = arith.addf %269, %271 : vector<8x64xf32>
    %cst_91 = arith.constant 0.000000e+00 : f32
    %273 = vector.broadcast %cst_91 : f32 to vector<8x64xf32>
    %274 = arith.maximumf %272, %273 : vector<8x64xf32>
    %275 = tpu.concatenate %172, %274 in 0 : vector<8x64xf32>, vector<8x64xf32> -> vector<16x64xf32>
    %c0_92 = arith.constant 0 : index
    %c0_93 = arith.constant 0 : index
    %276 = vector.load %arg7[%c0_92, %c0_93] : memref<8x16xf32, #tpu.memory_space<vmem>>, vector<8x16xf32>
    %cst_94 = arith.constant dense<0.000000e+00> : vector<8x64xf32>
    %277 = tpu.matmul %276, %275, %cst_94 {dimension_numbers = #tpu.dot_dimension_numbers<[1], [0], [0], [1], [0, 0, 1, 1], [], []>} : vector<8x16xf32>, vector<16x64xf32>, vector<8x64xf32> -> vector<8x64xf32>
    %c0_95 = arith.constant 0 : index
    %c0_96 = arith.constant 0 : index
    %278 = vector.load %arg8[%c0_95, %c0_96] : memref<8x1xf32, #tpu.memory_space<vmem>>, vector<8x1xf32>
    %279 = vector.broadcast %278 : vector<8x1xf32> to vector<8x64xf32>
    %280 = arith.addf %277, %279 : vector<8x64xf32>
    %cst_97 = arith.constant 0.000000e+00 : f32
    %281 = vector.broadcast %cst_97 : f32 to vector<8x64xf32>
    %282 = arith.maximumf %280, %281 : vector<8x64xf32>
    %283 = arith.addf %70, %282 : vector<8x64xf32>
    %c0_98 = arith.constant 0 : index
    %c0_99 = arith.constant 0 : index
    %c0_100 = arith.constant 0 : index
    %284 = vector.load %arg9[%c0_98, %c0_99, %c0_100] : memref<1x8x64xf32, #tpu.memory_space<vmem>>, vector<1x8x64xf32>
    %285 = vector.shape_cast %284 : vector<1x8x64xf32> to vector<8x64xf32>
    %286 = vector.shape_cast %283 : vector<8x64xf32> to vector<1x8x64xf32>
    tpu.vector_store %arg9[%c0_98, %c0_99, %c0_100], %286 {strides = array<i32>} : memref<1x8x64xf32, #tpu.memory_space<vmem>>, vector<1x8x64xf32>,
    return
  }
  func.func @transform_0(%arg0: i32) -> (i32, i32) {
    %c0_i32 = arith.constant 0 : i32
    %c0_i32_0 = arith.constant 0 : i32
    %c0_i32_1 = arith.constant 0 : i32
    return %c0_i32, %c0_i32_0 : i32, i32
  }
  func.func @transform_1(%arg0: i32) -> (i32, i32, i32) {
    %c0_i32 = arith.constant 0 : i32
    %c0_i32_0 = arith.constant 0 : i32
    %c0_i32_1 = arith.constant 0 : i32
    return %arg0, %c0_i32, %c0_i32_0 : i32, i32, i32
  }
  func.func @transform_2(%arg0: i32) -> (i32, i32) {
    %c0_i32 = arith.constant 0 : i32
    %c0_i32_0 = arith.constant 0 : i32
    %c0_i32_1 = arith.constant 0 : i32
    return %c0_i32, %c0_i32_0 : i32, i32
  }
  func.func @transform_3(%arg0: i32) -> (i32, i32) {
    %c0_i32 = arith.constant 0 : i32
    %c0_i32_0 = arith.constant 0 : i32
    %c0_i32_1 = arith.constant 0 : i32
    return %c0_i32, %c0_i32_0 : i32, i32
  }
  func.func @transform_4(%arg0: i32) -> (i32, i32) {
    %c0_i32 = arith.constant 0 : i32
    %c0_i32_0 = arith.constant 0 : i32
    %c0_i32_1 = arith.constant 0 : i32
    return %c0_i32, %c0_i32_0 : i32, i32
  }
  func.func @transform_5(%arg0: i32) -> (i32, i32) {
    %c0_i32 = arith.constant 0 : i32
    %c0_i32_0 = arith.constant 0 : i32
    %c0_i32_1 = arith.constant 0 : i32
    return %c0_i32, %c0_i32_0 : i32, i32
  }
  func.func @transform_6(%arg0: i32) -> (i32, i32) {
    %c0_i32 = arith.constant 0 : i32
    %c0_i32_0 = arith.constant 0 : i32
    %c0_i32_1 = arith.constant 0 : i32
    return %c0_i32, %c0_i32_0 : i32, i32
  }
  func.func @transform_7(%arg0: i32) -> (i32, i32) {
    %c0_i32 = arith.constant 0 : i32
    %c0_i32_0 = arith.constant 0 : i32
    %c0_i32_1 = arith.constant 0 : i32
    return %c0_i32, %c0_i32_0 : i32, i32
  }
  func.func @transform_8(%arg0: i32) -> (i32, i32, i32) {
    %c0_i32 = arith.constant 0 : i32
    %c0_i32_0 = arith.constant 0 : i32
    %c0_i32_1 = arith.constant 0 : i32
    return %arg0, %c0_i32, %c0_i32_0 : i32, i32, i32
  }
}

</mosaic_0001>

<bundles_post_ra>
// kernel: tpu_custom_call.1
= control target key start
LH: loop header
LB: loop body
LE: loop exit
PB: predicated region body
PF: predicated region fallthrough
CT: control target
= control target key end

     0   :  { %13 = vsyncpa [#allocation3], 0  ;;  %s1596_s0 = inlined_call_operand.hbm [shape: s32[1,64], index: 0, kind: input, shape index: {}]   ;;  %s1597_s1 = inlined_call_operand.vmem [shape: f32[2,8,64], index: 1, kind: input, shape index: {}]   ;;  %s1598_s2 = inlined_call_operand.vmem [shape: f32[8,72], index: 2, kind: input, shape index: {}]   ;;  %s1599_s3 = inlined_call_operand.vmem [shape: f32[8,1], index: 3, kind: input, shape index: {}]   ;;  %s1600_s4 = inlined_call_operand.vmem [shape: f32[8,18], index: 4, kind: input, shape index: {}]   ;;  %s1601_s5 = inlined_call_operand.vmem [shape: f32[8,2], index: 5, kind: input, shape index: {}]   ;;  %s1602_s6 = inlined_call_operand.hbm [shape: f32[8,16], index: 6, kind: input, shape index: {}]   ;;  %s1603_s7 = inlined_call_operand.vmem [shape: f32[8,1], index: 7, kind: input, shape index: {}]   ;;  %s1604_s8 = inlined_call_operand.hbm [shape: f32[2,8,64], index: 8, kind: output, shape index: {}]  }
   0x1   :  { %14 = vsyncpa [#allocation6], 0 }
   0x2   :  { %15 = vsyncpa [#allocation4], 0 }
   0x3   :  { %17 = vsyncpa [#allocation4 + $0x1], 0  ;;  %s1263_s27 = smov 0   ;;  %s1265_s28 = smov 0  }
   0x4   :  { %s1267_s29 = smov 0   ;;  %s1269_s30 = smov 0  }
   0x5 LB: > { %s1284_s9 = sadd.s32 4294967295, %s1177_s30   ;;  %s874_s10 = sadd.s32 4294967294, %s1177_s30   ;;  %s1177_s30 = sphi %s1269_s30, %s1630_s30   ;;  %s1173_s29 = sphi %s1267_s29, %s1629_s29   ;;  %s1169_s28 = sphi %s1265_s28, %s1628_s28   ;;  %s1165_s27 = sphi %s1263_s27, %s1627_s27  }
   0x6   : > { %s1288_s11 = sadd.s32 1, %s1177_s30   ;;  %s203_s12 = sadd.s32 1, %s1173_s29 }
   0x7   : > { %s200_s13 = ssub.s32 %s1177_s30, %s1288_s11  ;;  %p213_p0 = scmp.ne.s32.totalorder %s1173_s29, %s1169_s28 }
   0x8   : > { %p201_p1 = scmp.eq.s32.totalorder %s200_s13, 0  ;;  %p214_p2 = scmp.eq.s32.totalorder %s1284_s9, 1 }
   0x9   : > { %p219_p3 = scmp.ne.s32.totalorder %s1169_s28, %s1165_s27  ;;  %p220_p4 = scmp.eq.s32.totalorder %s874_s10, 1 }
   0xa   : > { %s1299_s14 = scalar_select %p201_p1, %s1173_s29, %s203_s12  }
   0xb   : > { %p1301_p5 = por %p214_p2, %p213_p0  ;;  %p1305_p6 = por %p220_p4, %p219_p3 }
   0xc   : > { %p875_p7 = scmp.ge.s32.totalorder %s1177_s30, 1  ;;  %p227_p8 = scmp.lt.s32.totalorder %s1177_s30, 3 }
   0xd   : > { %s1608_s15 = scalar_select %p1301_p5, 1, 0 }
   0xe   : > { %s1609_s16 = scalar_select %p1305_p6, 1, 0 }
   0xf   : > { %p1605_p9 = scmp.eq.s32.totalorder %s1284_s9, 0  ;;  %p1312_p10 = pnand %p875_p7, %p227_p8 }
  0x10   : > { %s1179_s18 = smov [#allocation2]   ;;  %s1180_s20 = smov [#allocation5]  }
  0x11   : > { %s1610_s17 = scalar_select %p1312_p10, 1, 0 }
  0x12   : > { %s240_s19 = sshll.u32 %s1179_s18, 4  ;;  %p950_p11 = pneg %p1312_p10  ;;  %s241_s19 = int_to_ptr.vmem [resolvable:$true] %s240_s19 }
  0x13   : > { %s263_s21 = sshll.u32 %s1180_s20, 4  ;;  %s1068_s23 = scalar_lea.vmem %s241_s19, 16  ;;  %s264_s21 = int_to_ptr.vmem [resolvable:$true] %s263_s21 }
  0x14   : > { %p1320_p12 = pnand %p1605_p9, %p950_p11  ;;  %p1069_p0 = scmp.ne.s32.totalorder %s241_s19, %s1068_s23 }
  0x15   : > { %s1075_s24 = scalar_lea.vmem %s241_s19, 32  ;;  %p1076_p3 = scmp.lt.s32.totalorder %s241_s19, %s241_s19 }
  0x16   : > { %p1059_p13 = pneg %p1320_p12  ;;  %p1077_p4 = scmp.lt.s32.totalorder %s1075_s24, %s1068_s23 }
  0x18   : > { %p1071_p1 = pnand %p1069_p0, %p1059_p13  ;;  %p1078_p7 = por %p1077_p4, %p1076_p3 }
  0x1a   : > { %p1072_p2 = pneg %p1071_p1 }
  0x1c   : > { %p1079_p8 = pnand %p1078_p7, %p1072_p2 }
  0x1e   : > { %1082 = shalt.err (!%p1079_p8)
}
  0x1f   : > { %953 = dma.hbm_to_vmem [thread:$0]  (!%p1320_p12), %s1596_s0, 16, %s241_s19, [#allocation3]  }
  0x20   : > { %s1094_s10 = scalar_lea.vmem %s264_s21, 128  ;;  %p1102_p1 = scmp.lt.s32.totalorder %s264_s21, %s264_s21 }
  0x21   : > { %p1095_p11 = scmp.ne.s32.totalorder %s264_s21, %s1094_s10  ;;  %p1103_p6 = scmp.lt.s32.totalorder %s1094_s10, %s1094_s10 }
  0x23   : > { %p1097_p9 = pnand %p1095_p11, %p1059_p13  ;;  %p1104_p5 = por %p1103_p6, %p1102_p1 }
  0x25   : > { %p1098_p0 = pneg %p1097_p9 }
  0x27   : > { %p1105_p10 = pnand %p1104_p5, %p1098_p0 }
  0x29   : > { %1108 = shalt.err (!%p1105_p10)
}
  0x2a   : > { %956 = dma.hbm_to_vmem [thread:$0]  (!%p1320_p12), %s1602_s6, 128, %s264_s21, [#allocation6]  }
  0x2b   : > { %p1612_p2 = scmp.ne.s32.totalorder %s1610_s17, 0 }
  0x2c   : > { %p1613_p3 = scmp.eq.s32.totalorder (!%p1612_p2), %s1284_s9, 0 }
  0x2d   : > { %286 = sbr.rel (%p1612_p2) target bundleno = 769 (0x301), region = 52 }
  0x32   : > { %1152 = dma.done.wait (%p1613_p3), [#allocation3], 16   ;;  %p1614_p13 = pmov %p1613_p3 }
  0x33   : > { %p1615_p9 = pmov %p1613_p3 }
  0x34   : > { %1154 = vsyncadd (%p1614_p13), [#allocation3], 4294967280 }
  0x35   : > { %1156 = dma.done.wait (%p1615_p9), [#allocation6], 128   ;;  %p1616_p5 = pmov %p1613_p3 }
  0x36   : > { %p323_p6 = scmp.lt.s32.totalorder %s1284_s9, 1  ;;  %v1181_v0 = vmov 0.0   ;;  %v1182_v1 = vmov 0   ;;  %s1183_s22 = smov 119   ;;  %vm1187_vm0 = vmmov 0   ;;  %v1188_v3 = vmov 9  }
  0x37   : > { %1158 = vsyncadd (%p1616_p5), [#allocation6], 4294967168  ;;  %912 = vmatprep.subr.mxu0 %v1181_v0  ;;  %933 = vmatprep.subr.mxu1 %v1181_v0  ;;  %s1184_s23 = smov 121   ;;  %s1185_s24 = smov 120   ;;  %v391_v4 = vld [vmem:[%s1599_s3] sm:$0xff]  ;;  %v1193_v6 = vmov 11   ;;  %v337_v23 = vlaneseq }
  0x38   : > { %s324_s17 = scalar_select %p323_p6, %s1284_s9, 1  ;;  %1036 = vset.pattern.permute.xlu0 %v1182_v1  ;;  %930 = vmatprep.mubr.msk.f32.mxu0 %vm1187_vm0, %v1181_v0  ;;  %v478_v5 = vld [vmem:[%s1600_s4] sm:$0xff]  ;;  %v1194_v7 = vmov 10   ;;  %v1195_v8 = vmov 13   ;;  %v1196_v9 = vmov 1   ;;  %v1197_v10 = vmov 4  }
  0x39   : > { %s1186_s25 = smov 127   ;;  %937 = vmatprep.mubr.msk.f32.mxu1 %vm1187_vm0, %v1181_v0  ;;  %1037 = vset.pattern.permute.xlu1 %v1188_v3  ;;  %s1189_s26 = smov 1   ;;  %v1198_v11 = vmov 2   ;;  %v1199_v12 = vmov 12   ;;  %v1200_v13 = vmov 5   ;;  %v1201_v14 = vmov 3  }
  0x3a   : > { %s883_s18 = sshll.u32 %s324_s17, 3  ;;  %s1190_s10 = smov 7   ;;  %v1202_v15 = vmov 6   ;;  %v1203_v16 = vmov 14   ;;  %v1204_v17 = vmov 17   ;;  %v1205_v18 = vmov 15  }
  0x3b   : > { %s326_s21 = scalar_lea.vmem %s1597_s1, %s883_s18  ;;  %s1191_s12 = smov 8   ;;  %v1206_v19 = vmov 16   ;;  %v1207_v20 = vmov 7   ;;  %v1208_v21 = vmov 8   ;;  %v1390_v22 = vld [vmem:[%s1601_s5] sm:$0xff]  ;;  %v338_v25 = vshrl.u32 %v337_v23, 7 }
  0x3c   : > { %v1360_v2 = vld [vmem:[%s326_s21] sm:$0xff]  ;;  %s1192_s13 = smov 9   ;;  %vm387_vm3 = vcmask 449536   ;;  %vm382_vm5 = vcmask 457728   ;;  %vm376_vm6 = vcmask 465920   ;;  %vm370_vm7 = vcmask 515072  }
  0x3d   : > { %384 = vrot.lane.b32.xlu0 %v1360_v2, %s1183_s22  ;;  %373 = vrot.lane.b32.xlu1 %v1360_v2, %s1184_s23  ;;  %v1394_v24 = vld [vmem:[#allocation2] sm:$0x1]  ;;  %v1397_v26 = vsub.s32 0, %v338_v25  ;;  %vm364_vm9 = vcmask 7168   ;;  %vm351_vm10 = vcmask 56320   ;;  %vm346_vm11 = vcmask 64512  }
  0x3e   : > { %vm353_vm1 = vcmp.lt.s32.totalorder %v1394_v24, 7  ;;  %vm335_vm2 = vcmp.ge.s32.totalorder %v1394_v24, 1  ;;  %vm333_vm12 = vcmask 72704   ;;  %vm890_vm13 = vmneg %vm346_vm11  ;;  %v390_v47 = vld [vmem:[%s1598_s2] sm:$0xff]  ;;  %vm397_vm14 = vcmask 588800   ;;  %s1209_s20 = smov 16  }
  0x3f   : > { %v354_v27 = vsel %vm353_vm1, 1, %v1182_v1  ;;  %v336_v29 = vsel %vm335_vm2, 1, %v1182_v1  ;;  %s1210_s21 = smov 18   ;;  %s1211_s17 = smov 14   ;;  %v696_v53 = vld [vmem:[%s1603_s7] sm:$0xff]  ;;  %vm580_vm15 = vcmp.ge.s32.totalorder %v1394_v24, 2 }
  0x40   : > { %v358_v28 = vrot.slane %v354_v27, %v1397_v26  ;;  %v340_v33 = vrot.slane %v336_v29, %v1397_v26  ;;  %s1212_s18 = smov 114   ;;  %s1213_s19 = smov 2   ;;  %vm610_vm0 = vcmp.lt.s32.totalorder %v1394_v24, 6  ;;  %vm578_vm1 = vcmask 146432  }
  0x41   : > { %379 = vrot.lane.b32.xlu0 %v1360_v2, %s1185_s24  ;;  %367 = vrot.lane.b32.xlu1 %v1360_v2, %s1186_s25  ;;  %vm597_vm2 = vcmask 130048   ;;  %p1625_p12 = scmp.ne.s32.totalorder %s1608_s15, 0 }
  0x42   : > { %vm1403_vm4 = vcmp.eq.s32.totalorder %v358_v28, 1  ;;  %vm1412_vm8 = vcmp.eq.s32.totalorder %v340_v33, 1 }
  0x45   : > { %361 = vrot.lane.b32.xlu0 %v1360_v2, %s1189_s26  ;;  %348 = vrot.lane.b32.xlu1 %v1360_v2, %s1190_s10 }
  0x49   : > { %343 = vrot.lane.b32.xlu0 %v1360_v2, %s1191_s12  ;;  %330 = vrot.lane.b32.xlu1 %v1360_v2, %s1192_s13 }
  0x4d   : > { %394 = vperm.xlu0 %1036, %v391_v4   ;;  %589 = vperm.xlu1 %1037, %v478_v5  }
  0x51   : > { %1040 = vset.pattern.permute.xlu0 %v1193_v6  ;;  %1038 = vset.pattern.permute.xlu1 %v1194_v7 }
  0x52   : > { %619 = vperm.xlu0 %1040, %v478_v5   ;;  %600 = vperm.xlu1 %1038, %v478_v5  }
  0x56   : > { %1044 = vset.pattern.permute.xlu0 %v1195_v8  ;;  %1039 = vset.pattern.permute.xlu1 %v1196_v9 }
  0x57   : > { %637 = vperm.xlu0 %1044, %v478_v5   ;;  %491 = vperm.xlu1 %1039, %v478_v5  }
  0x5b   : > { %1045 = vset.pattern.permute.xlu0 %v1197_v10  ;;  %1041 = vset.pattern.permute.xlu1 %v1198_v11  ;;  %v581_v11 = vsel %vm580_vm15, 1, %v1182_v1 }
  0x5c   : > { %519 = vperm.xlu0 %1045, %v478_v5   ;;  %502 = vperm.xlu1 %1041, %v478_v5  }
  0x60   : > { %1042 = vset.pattern.permute.xlu1 %v1199_v12  ;;  %1047 = vset.pattern.permute.xlu0 %v1200_v13 }
  0x61   : > { %631 = vperm.xlu1 %1042, %v478_v5   ;;  %530 = vperm.xlu0 %1047, %v478_v5  }
  0x65   : > { %1043 = vset.pattern.permute.xlu1 %v1201_v14  ;;  %1049 = vset.pattern.permute.xlu0 %v1202_v15  ;;  %v611_v14 = vsel %vm610_vm0, 1, %v1182_v1  ;;  %v585_v15 = vrot.slane %v581_v11, %v1397_v26  ;;  %vm627_vm0 = vcmask 15360  }
  0x66   : > { %513 = vperm.xlu1 %1043, %v478_v5   ;;  %541 = vperm.xlu0 %1049, %v478_v5  }
  0x6a   : > { %1046 = vset.pattern.permute.xlu1 %v1203_v16  ;;  %1052 = vset.pattern.permute.xlu0 %v1204_v17  ;;  %v615_v16 = vrot.slane %v611_v14, %v1397_v26 }
  0x6b   : > { %649 = vperm.xlu1 %1046, %v478_v5   ;;  %684 = vperm.xlu0 %1052, %v478_v5  }
  0x6c   : > { %vm1511_vm15 = vcmp.eq.s32.totalorder %v615_v16, 1 }
  0x6f   : > { %1048 = vset.pattern.permute.xlu1 %v1205_v18  ;;  %1053 = vset.pattern.permute.xlu0 %v1182_v1 }
  0x70   : > { %661 = vperm.xlu1 %1048, %v478_v5   ;;  %481 = vperm.xlu0 %1053, %v478_v5  }
  0x74   : > { %1050 = vset.pattern.permute.xlu1 %v1206_v19 }
  0x75   : > { %672 = vperm.xlu1 %1050, %v478_v5  }
  0x79   : > { %1051 = vset.pattern.permute.xlu1 %v1207_v20 }
  0x7a   : > { %551 = vperm.xlu1 %1051, %v478_v5  }
  0x7e   : > { %1054 = vset.pattern.permute.xlu1 %v1208_v21 }
  0x7f   : > { %562 = vperm.xlu1 %1054, %v478_v5  }
  0x83   : > { %1055 = vset.pattern.permute.xlu1 %v1196_v9 }
  0x84   : > { %690 = vperm.xlu1 %1055, %v1390_v22  }
  0x88   : > { %1056 = vset.pattern.permute.xlu1 %v1182_v1 }
  0xaf   : > { %v385_v31 = vpop.permute.xlu0 %384  ;;  %v374_v32 = vpop.permute.xlu1 %373 }
  0xb0   : > { %v388_v34 = vsel %vm387_vm3, %v385_v31, 0.0  ;;  %v377_v38 = vsel %vm376_vm6, %v374_v32, 0.0 }
  0xb1   : > { %913 = vmatpush3.msk.msra.mxu0 %vm1403_vm4, %v388_v34 }
  0xb2   : > { %914 = vmatprep.subr.mxu0 %v1181_v0 }
  0xb3   : > { %v380_v35 = vpop.permute.xlu0 %379  ;;  %v368_v36 = vpop.permute.xlu1 %367 }
  0xb4   : > { %915 = vmatpush3.msk.msra.mxu0 %vm382_vm5, %v380_v35  ;;  %v371_v39 = vsel %vm370_vm7, %v368_v36, 0.0 }
  0xb5   : > { %916 = vmatprep.subr.mxu0 %v1181_v0 }
  0xb6   : > { %917 = vmatpush3.msk.msra.mxu0 %vm1412_vm8, %v377_v38 }
  0xb7   : > { %918 = vmatprep.subr.mxu0 %v1181_v0  ;;  %v362_v40 = vpop.permute.xlu0 %361  ;;  %v349_v41 = vpop.permute.xlu1 %348 }
  0xb8   : > { %919 = vmatpush3.msk.msra.mxu0 %vm1403_vm4, %v371_v39  ;;  %v365_v42 = vsel %vm364_vm9, 0.0, %v362_v40  ;;  %v352_v43 = vsel %vm351_vm10, 0.0, %v349_v41 }
  0xb9   : > { %920 = vmatprep.subr.mxu0 %v1181_v0 }
  0xba   : > { %921 = vmatpush3.msra.mxu0 %v1360_v2 }
  0xbb   : > { %922 = vmatprep.subr.mxu0 %v1181_v0  ;;  %v331_v44 = vpop.permute.xlu1 %330  ;;  %v344_v45 = vpop.permute.xlu0 %343 }
  0xbc   : > { %923 = vmatpush3.msk.msra.mxu0 %vm1412_vm8, %v365_v42  ;;  %v334_v46 = vsel %vm333_vm12, 0.0, %v331_v44 }
  0xbd   : > { %924 = vmatprep.subr.mxu0 %v1181_v0 }
  0xbe   : > { %925 = vmatpush3.msk.msra.mxu0 %vm1403_vm4, %v352_v43 }
  0xbf   : > { %926 = vmatprep.subr.mxu0 %v1181_v0 }
  0xc0   : > { %927 = vmatpush3.msk.msra.mxu0 %vm890_vm13, %v344_v45  ;;  %vm608_vm13 = vcmask 113664  }
  0xc1   : > { %928 = vmatprep.subr.mxu0 %v1181_v0 }
  0xc2   : > { %929 = vmatpush3.msk.msra.mxu0 %vm1412_vm8, %v334_v46 }
  0xc3   : > { %931 = vmatmul.mubr.msk.f32.vlgmr.msra.gmra.mxu0 %vm397_vm14, %v390_v47  ;;  %vm1505_vm14 = vcmp.eq.s32.totalorder %v585_v15, 1 }
  0xc8   : > { %v395_v48 = vpop.permute.xlu0 %394  ;;  %v590_v54 = vpop.permute.xlu1 %589 }
  0xcd   : > { %v601_v55 = vpop.permute.xlu1 %600  ;;  %v620_v60 = vpop.permute.xlu0 %619 }
  0xd2   : > { %v492_v56 = vpop.permute.xlu1 %491  ;;  %v1478_v62 = vpop.permute.xlu0 %637 }
  0xd7   : > { %v503_v57 = vpop.permute.xlu1 %502  ;;  %v1482_v2 = vpop.permute.xlu0 %519 }
  0xdc   : > { %v632_v58 = vpop.permute.xlu1 %631  ;;  %v1486_v4 = vpop.permute.xlu0 %530 }
  0xe1   : > { %v1474_v59 = vpop.permute.xlu1 %513  ;;  %v1490_v6 = vpop.permute.xlu0 %541 }
  0xe6   : > { %v1476_v61 = vpop.permute.xlu1 %649  ;;  %v1494_v8 = vpop.permute.xlu0 %684 }
  0xeb   : > { %v1480_v63 = vpop.permute.xlu1 %661  ;;  %v482_v10 = vpop.permute.xlu0 %481 }
  0xf0   : > { %v1484_v3 = vpop.permute.xlu1 %672 }
  0xf5   : > { %v1488_v5 = vpop.permute.xlu1 %551 }
  0xfa   : > { %v1492_v7 = vpop.permute.xlu1 %562 }
  0xff   : > { %v1496_v9 = vpop.permute.xlu1 %690 }
 0x183   : > { %v467_v49 = vpop.f32.mrf.mxu0 }
 0x184   : > { %v468_v50 = vadd.f32 %v467_v49, %v395_v48 }
 0x185   : > { %v932_v51 = vpop.f32.mrf.mxu0 }
 0x186   : > { %v1444_v52 = vmax.f32 %v468_v50, 0.0 }
 0x188   : > { %594 = vrot.lane.b32.xlu0 %v1444_v52, %s1209_s20  ;;  %575 = vrot.lane.b32.xlu1 %v1444_v52, %s1210_s21  ;;  %s1214_s20 = smov 112  }
 0x18c   : > { %473 = vrot.lane.b32.xlu0 %v1444_v52, %s1192_s13  ;;  %605 = vrot.lane.b32.xlu1 %v1444_v52, %s1211_s17  ;;  %s1215_s13 = smov 126  }
 0x190   : > { %486 = vrot.lane.b32.xlu0 %v1444_v52, %s1191_s12  ;;  %496 = vrot.lane.b32.xlu1 %v1444_v52, %s1190_s10  ;;  %s1217_s10 = smov [#allocation7]  }
 0x194   : > { %654 = vrot.lane.b32.xlu0 %v1444_v52, %s1212_s18  ;;  %624 = vrot.lane.b32.xlu1 %v1444_v52, %s1213_s19 }
 0x198   : > { %666 = vrot.lane.b32.xlu0 %v1444_v52, %s1214_s20  ;;  %507 = vrot.lane.b32.xlu1 %v1444_v52, %s1189_s26  ;;  %s1216_s26 = smov 110  }
 0x19c   : > { %546 = vrot.lane.b32.xlu0 %v1444_v52, %s1185_s24  ;;  %642 = vrot.lane.b32.xlu1 %v1444_v52, %s1215_s13  ;;  %s896_s24 = sshll.u32 %s1284_s9, 7  ;;  %s1113_s9 = sshll.u32 %s1217_s10, 4  ;;  %s1114_s9 = int_to_ptr.vmem [resolvable:$false] %s1113_s9 }
 0x19d   : > { %s791_s19 = scalar_lea.hbm %s1604_s8, %s896_s24  ;;  %s1115_s12 = scalar_lea.vmem %s1114_s9, 256 }
 0x1a0   : > { %556 = vrot.lane.b32.xlu0 %v1444_v52, %s1183_s22  ;;  %524 = vrot.lane.b32.xlu1 %v1444_v52, %s1186_s25  ;;  %s320_s22 = sand.u32 1, %s1169_s28  }
 0x1a1   : > { %s780_s20 = scalar_lea.sflag [#allocation4], %s320_s22 }
 0x1a4   : > { %699 = vperm.xlu0 %1053, %v696_v53   ;;  %535 = vrot.lane.b32.xlu1 %v1444_v52, %s1184_s23  ;;  %s882_s23 = sshll.u32 %s320_s22, 3 }
 0x1a5   : > { %s322_s25 = scalar_lea.vmem [#allocation7], %s882_s23 }
 0x1a6   : > { %s793_s21 = sshll.u32 %s322_s25, 4  ;;  %s794_s21 = int_to_ptr.vmem [resolvable:$true] %s793_s21 }
 0x1a7   : > { %s1109_s13 = scalar_lea.vmem %s794_s21, 128  ;;  %p1116_p8 = scmp.lt.s32.totalorder %s794_s21, %s1114_s9 }
 0x1a8   : > { %677 = vrot.lane.b32.xlu1 %v1444_v52, %s1216_s26  ;;  %p1110_p10 = scmp.ne.s32.totalorder %s794_s21, %s1109_s13  ;;  %p1117_p11 = scmp.lt.s32.totalorder %s1115_s12, %s1109_s13 }
 0x1aa   : > { %p1111_p4 = pnand %p1110_p10, %p1625_p12  ;;  %p1118_p0 = por %p1117_p11, %p1116_p8 }
 0x1ac   : > { %570 = vperm.xlu1 %1056, %v1390_v22   ;;  %p1112_p7 = pneg %p1111_p4 }
 0x1ae   : > { %p1119_p1 = pnand %p1118_p0, %p1112_p7 }
 0x1fa   : > { %v576_v12 = vpop.permute.xlu1 %575  ;;  %v595_v13 = vpop.permute.xlu0 %594 }
 0x1fb   : > { %v579_v21 = vsel %vm578_vm1, 0.0, %v576_v12  ;;  %v598_v25 = vsel %vm597_vm2, 0.0, %v595_v13 }
 0x1fc   : > { %v587_v29 = vsel %vm1505_vm14, %v579_v21, 0.0  ;;  %v603_v40 = vmul.f32 %v601_v55, %v598_v25 }
 0x1fd   : > { %v592_v39 = vmul.f32 %v590_v54, %v587_v29 }
 0x1fe   : > { %v606_v17 = vpop.permute.xlu1 %605  ;;  %v474_v18 = vpop.permute.xlu0 %473 }
 0x1ff   : > { %v476_v19 = vsel %vm333_vm12, 0.0, %v474_v18  ;;  %v609_v26 = vsel %vm608_vm13, 0.0, %v606_v17  ;;  %v604_v47 = vadd.f32 %v603_v40, %v592_v39 }
 0x200   : > { %v477_v22 = vsel %vm1412_vm8, %v476_v19, 0.0  ;;  %v617_v35 = vsel %vm1511_vm15, %v609_v26, 0.0 }
 0x201   : > { %v484_v31 = vmul.f32 %v482_v10, %v477_v22  ;;  %v622_v44 = vmul.f32 %v620_v60, %v617_v35  ;;  %v640_v60 = vmul.f32 %v1478_v62, %v1444_v52 }
 0x202   : > { %v497_v23 = vpop.permute.xlu1 %496  ;;  %v487_v24 = vpop.permute.xlu0 %486 }
 0x203   : > { %v499_v27 = vsel %vm351_vm10, 0.0, %v497_v23  ;;  %v489_v28 = vsel %vm346_vm11, 0.0, %v487_v24  ;;  %vm645_vm10 = vcmask 506880   ;;  %v623_v50 = vadd.f32 %v622_v44, %v604_v47 }
 0x204   : > { %v500_v32 = vsel %vm1403_vm4, %v499_v27, 0.0  ;;  %v494_v33 = vmul.f32 %v492_v56, %v489_v28  ;;  %vm657_vm11 = vcmask 408576  }
 0x205   : > { %v505_v34 = vmul.f32 %v503_v57, %v500_v32 }
 0x206   : > { %v495_v36 = vadd.f32 %v494_v33, %v484_v31  ;;  %v625_v38 = vpop.permute.xlu1 %624  ;;  %v655_v45 = vpop.permute.xlu0 %654 }
 0x207   : > { %v628_v41 = vsel %vm627_vm0, 0.0, %v625_v38  ;;  %v658_v10 = vsel %vm657_vm11, %v655_v45, 0.0 }
 0x208   : > { %v506_v42 = vadd.f32 %v505_v34, %v495_v36  ;;  %v629_v43 = vsel %vm1505_vm14, %v628_v41, 0.0  ;;  %v659_v15 = vsel %vm1505_vm14, %v658_v10, 0.0 }
 0x209   : > { %v634_v48 = vmul.f32 %v632_v58, %v629_v43  ;;  %v695_v43 = vld [vmem:[#allocation5] sm:$0xff] }
 0x20a   : > { %v508_v46 = vpop.permute.xlu1 %507  ;;  %v667_v55 = vpop.permute.xlu0 %666 }
 0x20b   : > { %v510_v49 = vsel %vm364_vm9, 0.0, %v508_v46  ;;  %v635_v53 = vadd.f32 %v634_v48, %v623_v50  ;;  %vm669_vm9 = vcmask 392192  }
 0x20c   : > { %v511_v54 = vsel %vm1412_vm8, %v510_v49, 0.0  ;;  %v670_v22 = vsel %vm669_vm9, %v667_v55, 0.0 }
 0x20d   : > { %v516_v11 = vmul.f32 %v1474_v59, %v511_v54  ;;  %v641_v13 = vadd.f32 %v640_v60, %v635_v53  ;;  %v664_v59 = vmul.f32 %v1480_v63, %v659_v15  ;;  %v675_v28 = vmul.f32 %v1484_v3, %v670_v22 }
 0x20e   : > { %v643_v51 = vpop.permute.xlu1 %642  ;;  %v547_v17 = vpop.permute.xlu0 %546 }
 0x20f   : > { %v646_v56 = vsel %vm645_vm10, %v643_v51, 0.0  ;;  %v517_v19 = vadd.f32 %v516_v11, %v506_v42  ;;  %v549_v32 = vsel %vm382_vm5, %v547_v17, 0.0 }
 0x210   : > { %v647_v57 = vsel %vm1511_vm15, %v646_v56, 0.0 }
 0x211   : > { %v652_v58 = vmul.f32 %v1476_v61, %v647_v57  ;;  %v522_v61 = vmul.f32 %v1482_v2, %v1444_v52 }
 0x212   : > { %v525_v12 = vpop.permute.xlu1 %524  ;;  %v557_v29 = vpop.permute.xlu0 %556 }
 0x213   : > { %v527_v14 = vsel %vm370_vm7, %v525_v12, 0.0  ;;  %v653_v16 = vadd.f32 %v652_v58, %v641_v13  ;;  %vm680_vm7 = vcmask 375808   ;;  %v523_v25 = vadd.f32 %v522_v61, %v517_v19 }
 0x214   : > { %v528_v18 = vsel %vm1403_vm4, %v527_v14, 0.0  ;;  %v559_v33 = vsel %vm387_vm3, %v557_v29, 0.0  ;;  %vm777_vm3 = vcmask 523264  }
 0x215   : > { %v533_v23 = vmul.f32 %v1486_v4, %v528_v18  ;;  %v665_v24 = vadd.f32 %v664_v59, %v653_v16  ;;  %v560_v3 = vsel %vm1403_vm4, %v559_v33, 0.0 }
 0x216   : > { %v536_v62 = vpop.permute.xlu1 %535  ;;  %v565_v39 = vmul.f32 %v1492_v7, %v560_v3 }
 0x217   : > { %v538_v21 = vsel %vm376_vm6, %v536_v62, 0.0  ;;  %v534_v31 = vadd.f32 %v533_v23, %v523_v25  ;;  %v676_v37 = vadd.f32 %v675_v28, %v665_v24 }
 0x218   : > { %v539_v20 = vsel %vm1412_vm8, %v538_v21, 0.0 }
 0x219   : > { %v544_v26 = vmul.f32 %v1490_v6, %v539_v20  ;;  %v554_v6 = vmul.f32 %v1488_v5, %v549_v32 }
 0x21a   : > { %v678_v27 = vpop.permute.xlu1 %677 }
 0x21b   : > { %v681_v2 = vsel %vm680_vm7, %v678_v27, 0.0  ;;  %v545_v34 = vadd.f32 %v544_v26, %v534_v31 }
 0x21c   : > { %v682_v63 = vsel %vm1511_vm15, %v681_v2, 0.0 }
 0x21d   : > { %v687_v4 = vmul.f32 %v1494_v8, %v682_v63  ;;  %v555_v38 = vadd.f32 %v554_v6, %v545_v34 }
 0x21f   : > { %v688_v35 = vadd.f32 %v687_v4, %v676_v37  ;;  %v566_v8 = vadd.f32 %v565_v39, %v555_v38  ;;  %v700_v30 = vpop.permute.xlu0 %699 }
 0x221   : > { %v693_v36 = vadd.f32 %v1496_v9, %v688_v35 }
 0x223   : > { %v694_v1 = vmax.f32 %v693_v36, 0.0 }
 0x225   : > { %934 = vmatpush3.msra.mxu1 %v694_v1 }
 0x226   : > { %935 = vmatprep.subr.mxu1 %v1181_v0 }
 0x227   : > { %v571_v40 = vpop.permute.xlu1 %570 }
 0x228   : > { %v573_v41 = vadd.f32 %v571_v40, %v566_v8 }
 0x22a   : > { %v574_v42 = vmax.f32 %v573_v41, 0.0 }
 0x22c   : > { %936 = vmatpush3.msra.mxu1 %v574_v42 }
 0x22d   : > { %938 = vmatmul.mubr.msk.f32.vlgmr.msra.gmra.mxu1 %vm597_vm2, %v695_v43 }
 0x2ed   : > { %v771_v5 = vpop.f32.mrf.mxu1 }
 0x2ee   : > { %v772_v9 = vadd.f32 %v771_v5, %v700_v30 }
 0x2ef   : > { %v939_v44 = vpop.f32.mrf.mxu1 }
 0x2f0   : > { %v775_v7 = vmax.f32 %v772_v9, 0.0 }
 0x2f2   : > { %v776_v0 = vadd.f32 %v775_v7, %v1444_v52 }
 0x2f4   : > { %778 = vst.msk [vmem:[%s322_s25] sm:$0xff] %vm777_vm3, %v776_v0 }
 0x2f5   : > { %1122 = shalt.err (!%p1119_p1)
}
 0x2f6   : > { %s1123_s26 = scalar_lea.hbm %s791_s19, 128  ;;  %s1127_s24 = scalar_lea.hbm %s1604_s8, 256 }
 0x2f7   : > { %p1124_p2 = scmp.ne.s32.totalorder %s791_s19, %s1123_s26  ;;  %p1128_p9 = scmp.lt.s32.totalorder %s791_s19, %s1604_s8 }
 0x2f8   : > { %p1129_p5 = scmp.lt.s32.totalorder %s1127_s24, %s1123_s26 }
 0x2f9   : > { %p1125_p3 = pnand %p1124_p2, %p1625_p12 }
 0x2fa   : > { %p1130_p6 = por %p1129_p5, %p1128_p9 }
 0x2fb   : > { %p1126_p13 = pneg %p1125_p3 }
 0x2fd   : > { %p1131_p10 = pnand %p1130_p6, %p1126_p13 }
 0x2ff   : > { %1134 = shalt.err (!%p1131_p10)
}
 0x300   : > { %948 = dma.vmem_to_hbm [thread:$0]  (%p1625_p12), %s794_s21, 128, %s791_s19, %s780_s20  }
 0x301 PF: > { %p965_p4 = scmp.ge.s32.totalorder %s1177_s30, 2  ;;  %s805_s18 = sand.u32 1, %s1165_s27  }
 0x302   : > { %p1626_p7 = scmp.ne.s32.totalorder %s1609_s16, 0  ;;  %s806_s13 = scalar_lea.sflag [#allocation4], %s805_s18 }
 0x304   : > { %p958_p8 = pnand %p965_p4, %p1626_p7 }
 0x306   : > { %p959_p11 = pneg %p958_p8 }
 0x308   : > { %1160 = dma.done.wait (%p959_p11), %s806_s13, 128  }
 0x309   : > { %1162 = vsyncadd (%p959_p11), %s806_s13, 4294967168  ;;  %p20_p0 = scmp.ge.s32.totalorder %s1288_s11, 4   ;;  %s1627_s27 = smov %s1169_s28 }
 0x30a   : > { %s1628_s28 = smov %s1173_s29  ;;  %s1629_s29 = smov %s1299_s14 }
 0x30b   : > { %s1630_s30 = smov %s1288_s11  ;;  %22 = sbr.rel (!%p20_p0) target bundleno = 5 (0x5), region = 96 }
 0x310   :  { %811 = vsyncpa [#allocation3], 1 }
 0x311   :  { %813 = vsyncpa [#allocation3 + $0x1], 1 }
 0x312   :  { %814 = vsyncpa [#allocation6], 1 }
 0x313   :  { %815 = vsyncpa [#allocation4], 1 }
 0x314   :  { %817 = vsyncpa [#allocation4 + $0x1], 1 }

</bundles_post_ra>
